<compile_context>
chip_gen: v7x
topology: tpu7x:2x2x1
jax: 0.10.0
libtpu: 0.0.40
codegen_flags: <defaults>
</compile_context>

<pallas_src>
import jax
import jax.numpy as jnp
from jax.experimental import pallas as pl
from jax.experimental.pallas import tpu as pltpu


def _round_up(n: int, m: int) -> int:
    return ((n + m - 1) // m) * m


_TM_CANDIDATES = (1024, 512, 256, 128)


def _vmem_budget():
    """Return (clamp_bytes, tile_target_bytes) for this TPU generation."""
    try:
        phys = int(pltpu.get_tpu_info().vmem_capacity_bytes)
    except Exception:  # pragma: no cover - conservative fallback
        phys = 64 << 20                       # assume v7x-sized VMEM
    # ~100 MiB on 128 MiB chips (v5e/v6e), ~52 MiB on 64 MiB chips (v7x),
    # always leaving headroom for Mosaic internal scratch / semaphores.
    clamp = (100 << 20) if phys >= (96 << 20) else (52 << 20)
    clamp = min(clamp, phys - (8 << 20))
    return clamp, int(0.7 * clamp)


# --------- antisymmetrize: W_anti = W - W^T (runs once per forward) ---------

def _antisym_kernel(w_ij_ref, w_ji_ref, o_ref):
    # Block (i, j) needs both W[i, j] and W[j, i]; the two inputs deliver them
    # via swapped index maps (correct for off-diagonal tiles).
    o_ref[...] = (w_ij_ref[...] - w_ji_ref[...].T).astype(o_ref.dtype)


def _antisymmetrize(w_pad: jax.Array, out_dtype) -> jax.Array:
    f_pad = w_pad.shape[0]
    if f_pad <= 512:
        tf = f_pad
    else:
        tf = next(t for t in (512, 256, 128) if f_pad % t == 0)
    grid = (f_pad // tf, f_pad // tf)
    return pl.pallas_call(
        _antisym_kernel,
        out_shape=jax.ShapeDtypeStruct((f_pad, f_pad), out_dtype),
        grid_spec=pltpu.PrefetchScalarGridSpec(
            num_scalar_prefetch=0,
            grid=grid,
            in_specs=[
                pl.BlockSpec((tf, tf), lambda i, j: (i, j)),
                pl.BlockSpec((tf, tf), lambda i, j: (j, i)),
            ],
            out_specs=pl.BlockSpec((tf, tf), lambda i, j: (i, j)),
        ),
        compiler_params=pltpu.CompilerParams(
            dimension_semantics=("parallel", "parallel"),
        ),
    )(w_pad, w_pad)


# --------- tiled MXU matmul kernels ------------------------------------------

def _matmul_f32_kernel(x_ref, w_ref, o_ref):
    # f32 output block is VMEM-resident across the K loop: accumulate in place.
    @pl.when(pl.program_id(2) == 0)
    def _init():
        o_ref[...] = jnp.zeros_like(o_ref)

    o_ref[...] += jnp.dot(x_ref[...], w_ref[...],
                          preferred_element_type=jnp.float32)


def _matmul_acc_kernel(x_ref, w_ref, o_ref, acc_ref):
    @pl.when(pl.program_id(2) == 0)
    def _init():
        acc_ref[...] = jnp.zeros_like(acc_ref)

    acc_ref[...] += jnp.dot(x_ref[...], w_ref[...],
                            preferred_element_type=jnp.float32)

    @pl.when(pl.program_id(2) == pl.num_programs(2) - 1)
    def _writeback():
        o_ref[...] = acc_ref[...].astype(o_ref.dtype)


def _fused_f32_kernel(x_ref, w_kj_ref, w_jk_ref, o_ref):
    @pl.when(pl.program_id(2) == 0)
    def _init():
        o_ref[...] = jnp.zeros_like(o_ref)

    w_anti = (w_kj_ref[...] - w_jk_ref[...].T).astype(jnp.bfloat16)
    o_ref[...] += jnp.dot(x_ref[...], w_anti,
                          preferred_element_type=jnp.float32)


def _fused_acc_kernel(x_ref, w_kj_ref, w_jk_ref, o_ref, acc_ref):
    @pl.when(pl.program_id(2) == 0)
    def _init():
        acc_ref[...] = jnp.zeros_like(acc_ref)

    w_anti = (w_kj_ref[...] - w_jk_ref[...].T).astype(jnp.bfloat16)
    acc_ref[...] += jnp.dot(x_ref[...], w_anti,
                            preferred_element_type=jnp.float32)

    @pl.when(pl.program_id(2) == pl.num_programs(2) - 1)
    def _writeback():
        o_ref[...] = acc_ref[...].astype(o_ref.dtype)


# --------- public entry point -------------------------------------------------

@jax.jit
def hamiltonian_layer(x: jax.Array, weights: jax.Array) -> jax.Array:
    """y = x @ (weights - weights.T).  x: (B, F), weights: (F, F)."""
    B, F = x.shape
    assert weights.shape == (F, F), (
        "HamiltonianLayer requires in_features == out_features")
    out_dtype = x.dtype
    acc_in_out = (out_dtype == jnp.float32)
    out_size = jnp.dtype(out_dtype).itemsize

    clamp, target = _vmem_budget()

    # --- feature (N / K) padding & tile -------------------------------------
    F_pad = _round_up(F, 128)
    if F_pad <= 1024:
        feat_tile = F_pad                      # whole feature dim per block
    else:
        F_pad = _round_up(F_pad, 512)          # guarantee a >=512 divisor
        feat_tile = 1024 if F_pad % 1024 == 0 else 512
    tn = tk = feat_tile

    # --- batch (M) padding & tile --------------------------------------------
    B_pad = _round_up(B, 128)

    def _precompute_fp(tm_):
        fp_ = (2 * tm_ * tk * 2            # x tile (bf16) x 2 buffers
               + 2 * tk * tn * 2           # W_anti tile (bf16) x 2 buffers
               + 2 * tm_ * tn * out_size)  # output tile x 2 buffers
        if not acc_in_out:
            fp_ += tm_ * tn * 4            # f32 accumulator scratch
        return fp_

    tm = 128
    for cand in _TM_CANDIDATES:
        if B_pad % cand == 0 and _precompute_fp(cand) <= target:
            tm = cand
            break

    # --- dispatch: fuse W - W^T when W_anti would be streamed only once ------
    fused = (B_pad // tm) == 1
    if fused:
        fp = (2 * tm * tk * 2              # x tile (bf16) x 2 buffers
              + 2 * 2 * tk * tn * 4        # two f32 W tiles x 2 buffers
              + 2 * tm * tn * out_size)    # output tile x 2 buffers
        if not acc_in_out:
            fp += tm * tn * 4
        if fp > target:
            fused = False
    if not fused:
        fp = _precompute_fp(tm)

    # v7x has 2 TensorCores: make sure a parallel axis has >=2 blocks.
    if ((B_pad // tm) == 1 and (F_pad // tn) == 1
            and F_pad >= 1024 and (F_pad // 2) % 128 == 0):
        tn = F_pad // 2

    vmem_limit = int(min(clamp, max(fp + fp // 4 + (4 << 20), 32 << 20)))

    x_pad = jnp.pad(x.astype(jnp.bfloat16), ((0, B_pad - B), (0, F_pad - F)))
    w_pad = jnp.pad(weights, ((0, F_pad - F), (0, F_pad - F)))

    grid = (B_pad // tm, F_pad // tn, F_pad // tk)
    out_shape = jax.ShapeDtypeStruct((B_pad, F_pad), out_dtype)
    x_spec = pl.BlockSpec((tm, tk), lambda i, j, k: (i, k))
    out_spec = pl.BlockSpec((tm, tn), lambda i, j, k: (i, j))
    scratch = [] if acc_in_out else [pltpu.VMEM((tm, tn), jnp.float32)]
    cparams = pltpu.CompilerParams(
        dimension_semantics=("parallel", "parallel", "arbitrary"),
        vmem_limit_bytes=vmem_limit,
    )
    # NOTE: if profiling shows the weight stream still DMA-exposed at small B,
    # a pipeline_mode=pl.Buffered(3) on the W spec is the next lever.

    if fused:
        kernel = _fused_f32_kernel if acc_in_out else _fused_acc_kernel
        y_pad = pl.pallas_call(
            kernel,
            out_shape=out_shape,
            grid_spec=pltpu.PrefetchScalarGridSpec(
                num_scalar_prefetch=0,
                grid=grid,
                in_specs=[
                    x_spec,
                    pl.BlockSpec((tk, tn), lambda i, j, k: (k, j)),  # W[k, j]
                    pl.BlockSpec((tn, tk), lambda i, j, k: (j, k)),  # W[j, k]
                ],
                out_specs=out_spec,
                scratch_shapes=scratch,
            ),
            compiler_params=cparams,
        )(x_pad, w_pad, w_pad)
    else:
        # Antisymmetrize ONCE (not per matmul grid step); bf16 halves W DMA.
        w_anti = _antisymmetrize(w_pad, jnp.bfloat16)
        kernel = _matmul_f32_kernel if acc_in_out else _matmul_acc_kernel
        y_pad = pl.pallas_call(
            kernel,
            out_shape=out_shape,
            grid_spec=pltpu.PrefetchScalarGridSpec(
                num_scalar_prefetch=0,
                grid=grid,
                in_specs=[
                    x_spec,
                    pl.BlockSpec((tk, tn), lambda i, j, k: (k, j)),
                ],
                out_specs=out_spec,
                scratch_shapes=scratch,
            ),
            compiler_params=cparams,
        )(x_pad, w_anti)

    return y_pad[:B, :F]


if __name__ == "__main__":
    key = jax.random.PRNGKey(0)

    def _reference(x, w):
        # Same bf16 operand rounding as the kernel, f32 accumulation.
        w_anti = (w - w.T).astype(jnp.bfloat16).astype(jnp.float32)
        return x.astype(jnp.bfloat16).astype(jnp.float32) @ w_anti

    # 1) Small shape consistent with the module (batch=8, in=out=32).
    #    Single M tile -> exercises the fused (W - W^T inside matmul) path.
    batch, features = 8, 32
    kx, kw, key = (*jax.random.split(key, 2), key)
    kx, kw = jax.random.split(jax.random.PRNGKey(0))
    x = jax.random.normal(kx, (batch, features), dtype=jnp.float32)
    weights = jax.random.normal(kw, (features, features), dtype=jnp.float32) / jnp.sqrt(
        jnp.float32(features))
    y = hamiltonian_layer(x, weights)
    jax.block_until_ready(y)
    assert y.shape == (batch, features)
    assert jnp.allclose(y, _reference(x, weights), atol=1e-2, rtol=1e-2), \
        "mismatch vs reference (fused path)"

    # 2) Slightly larger shape -> multiple M tiles, exercises the
    #    antisymmetrize + matmul (precompute) path.
    batch2, features2 = 384, 256
    kx2, kw2 = jax.random.split(jax.random.PRNGKey(1))
    x2 = jax.random.normal(kx2, (batch2, features2), dtype=jnp.float32)
    weights2 = jax.random.normal(
        kw2, (features2, features2), dtype=jnp.float32) / jnp.sqrt(jnp.float32(features2))
    y2 = hamiltonian_layer(x2, weights2)
    jax.block_until_ready(y2)
    assert y2.shape == (batch2, features2)
    assert jnp.allclose(y2, _reference(x2, weights2), atol=1e-2, rtol=1e-2), \
        "mismatch vs reference (precompute path)"

    print("KERNEL_OK")
</pallas_src>

<mosaic_0001>
module attributes {stable_mosaic.version = 11 : i64} {
  func.func @_fused_f32_kernel(%arg0: i32, %arg1: i32, %arg2: i32, %arg3: memref<128x128xbf16, #tpu.memory_space<vmem>>, %arg4: memref<128x128xf32, #tpu.memory_space<vmem>>, %arg5: memref<128x128xf32, #tpu.memory_space<vmem>>, %arg6: memref<128x128xf32, #tpu.memory_space<vmem>>) attributes {dimension_semantics = [#tpu.dimension_semantics<parallel>, #tpu.dimension_semantics<parallel>, #tpu.dimension_semantics<arbitrary>], iteration_bounds = array<i64: 1, 1, 1>, scalar_prefetch = 0 : i64, scratch_operands = 0 : i64, tpu.core_type = #tpu.core_type<tc>, window_params = [{transform_indices = @transform_0, window_bounds = array<i64: 128, 128>}, {transform_indices = @transform_1, window_bounds = array<i64: 128, 128>}, {transform_indices = @transform_2, window_bounds = array<i64: 128, 128>}, {transform_indices = @transform_3, window_bounds = array<i64: 128, 128>}]} {
    %c0_i32 = arith.constant 0 : i32
    %0 = arith.cmpi eq, %arg2, %c0_i32 : i32
    %1 = arith.extui %0 : i1 to i32
    %c0_i32_0 = arith.constant 0 : i32
    %2 = arith.cmpi ne, %1, %c0_i32_0 : i32
    scf.if %2 {
      %cst_10 = arith.constant 0.000000e+00 : f32
      %13 = vector.broadcast %cst_10 : f32 to vector<128x128xf32>
      %c0_11 = arith.constant 0 : index
      %c0_12 = arith.constant 0 : index
      %14 = vector.load %arg6[%c0_11, %c0_12] : memref<128x128xf32, #tpu.memory_space<vmem>>, vector<128x128xf32>
      tpu.vector_store %arg6[%c0_11, %c0_12], %13 {strides = array<i32>} : memref<128x128xf32, #tpu.memory_space<vmem>>, vector<128x128xf32>,
    } else {
    }
    %c0 = arith.constant 0 : index
    %c0_1 = arith.constant 0 : index
    %3 = vector.load %arg4[%c0, %c0_1] : memref<128x128xf32, #tpu.memory_space<vmem>>, vector<128x128xf32>
    %c0_2 = arith.constant 0 : index
    %c0_3 = arith.constant 0 : index
    %4 = vector.load %arg5[%c0_2, %c0_3] : memref<128x128xf32, #tpu.memory_space<vmem>>, vector<128x128xf32>
    %5 = tpu.transpose %4, [1, 0] : vector<128x128xf32> -> vector<128x128xf32>
    %6 = arith.subf %3, %5 : vector<128x128xf32>
    %7 = arith.truncf %6 : vector<128x128xf32> to vector<128x128xbf16>
    %c0_4 = arith.constant 0 : index
    %c0_5 = arith.constant 0 : index
    %8 = vector.load %arg6[%c0_4, %c0_5] : memref<128x128xf32, #tpu.memory_space<vmem>>, vector<128x128xf32>
    %c0_6 = arith.constant 0 : index
    %c0_7 = arith.constant 0 : index
    %9 = vector.load %arg3[%c0_6, %c0_7] : memref<128x128xbf16, #tpu.memory_space<vmem>>, vector<128x128xbf16>
    %cst = arith.constant dense<0.000000e+00> : vector<128x128xf32>
    %10 = tpu.matmul %9, %7, %cst {dimension_numbers = #tpu.dot_dimension_numbers<[1], [0], [0], [1], [0, 0, 1, 1], [], []>} : vector<128x128xbf16>, vector<128x128xbf16>, vector<128x128xf32> -> vector<128x128xf32>
    %11 = arith.addf %8, %10 : vector<128x128xf32>
    %c0_8 = arith.constant 0 : index
    %c0_9 = arith.constant 0 : index
    %12 = vector.load %arg6[%c0_8, %c0_9] : memref<128x128xf32, #tpu.memory_space<vmem>>, vector<128x128xf32>
    tpu.vector_store %arg6[%c0_8, %c0_9], %11 {strides = array<i32>} : memref<128x128xf32, #tpu.memory_space<vmem>>, vector<128x128xf32>,
    return
  }
  func.func @transform_0(%arg0: i32, %arg1: i32, %arg2: i32) -> (i32, i32) {
    %c0_i32 = arith.constant 0 : i32
    return %arg0, %arg2 : i32, i32
  }
  func.func @transform_1(%arg0: i32, %arg1: i32, %arg2: i32) -> (i32, i32) {
    %c0_i32 = arith.constant 0 : i32
    return %arg2, %arg1 : i32, i32
  }
  func.func @transform_2(%arg0: i32, %arg1: i32, %arg2: i32) -> (i32, i32) {
    %c0_i32 = arith.constant 0 : i32
    return %arg1, %arg2 : i32, i32
  }
  func.func @transform_3(%arg0: i32, %arg1: i32, %arg2: i32) -> (i32, i32) {
    %c0_i32 = arith.constant 0 : i32
    return %arg0, %arg1 : i32, i32
  }
}

</mosaic_0001>

<bundles_post_ra>
// kernel: hamiltonian_layer.1
= control target key start
LH: loop header
LB: loop body
LE: loop exit
PB: predicated region body
PF: predicated region fallthrough
CT: control target
= control target key end

     0   :  { %s605_s2 = inlined_call_operand.vmem [shape: f32[128,128], index: 2, kind: input, shape index: {}, may-alias: {1,2}]   ;;  %s606_s0 = inlined_call_operand.vmem [shape: bf16[128,128], index: 0, kind: input, shape index: {}]   ;;  %s607_s1 = inlined_call_operand.vmem [shape: f32[128,128], index: 1, kind: input, shape index: {}, may-alias: {1,2}]   ;;  %s608_s3 = inlined_call_operand.vmem [shape: f32[128,128], index: 3, kind: output, shape index: {}]  }
   0x1   :  { %v51_v0 = vld [vmem:[%s605_s2] sm:$0xff]  ;;  %v52_v1 = vld [vmem:[%s605_s2 + $0x8] sm:$0xff]  ;;  %v53_v2 = vld [vmem:[%s605_s2 + $0x10] sm:$0xff] }
   0x2   :  { %67 = vxpose.xlu0.b32.start [1/16] %v51_v0, 128  ;;  %v54_v3 = vld [vmem:[%s605_s2 + $0x18] sm:$0xff]  ;;  %v55_v4 = vld [vmem:[%s605_s2 + $0x20] sm:$0xff]  ;;  %v56_v5 = vld [vmem:[%s605_s2 + $0x28] sm:$0xff] }
   0x3   :  { %v57_v6 = vld [vmem:[%s605_s2 + $0x30] sm:$0xff]  ;;  %v58_v7 = vld [vmem:[%s605_s2 + $0x38] sm:$0xff]  ;;  %v59_v8 = vld [vmem:[%s605_s2 + $0x40] sm:$0xff] }
   0x4   :  { %v60_v9 = vld [vmem:[%s605_s2 + $0x48] sm:$0xff]  ;;  %v61_v10 = vld [vmem:[%s605_s2 + $0x50] sm:$0xff]  ;;  %v62_v11 = vld [vmem:[%s605_s2 + $0x58] sm:$0xff] }
   0x5   :  { %v63_v12 = vld [vmem:[%s605_s2 + $0x60] sm:$0xff]  ;;  %v64_v13 = vld [vmem:[%s605_s2 + $0x68] sm:$0xff]  ;;  %v65_v14 = vld [vmem:[%s605_s2 + $0x70] sm:$0xff] }
   0x6   :  { %68 = vxpose.xlu0.b32.cont [2/16] %v52_v1, 128  ;;  %v66_v15 = vld [vmem:[%s605_s2 + $0x78] sm:$0xff]  ;;  %v409_v16 = vld [vmem:[%s606_s0] sm:$0xff]   ;;  %v36_v20 = vld [vmem:[%s607_s1 + $0x8] sm:$0xff] }
   0x7   :  { %v410_v17 = vld [vmem:[%s606_s0 + $0x20] sm:$0xff]   ;;  %376 = vmatprep.mubr.bf16.mxu0 %v409_v16  ;;  %v37_v26 = vld [vmem:[%s607_s1 + $0x10] sm:$0xff]  ;;  %v38_v27 = vld [vmem:[%s607_s1 + $0x18] sm:$0xff] }
   0x8   :  { %384 = vmatprep.mubr.bf16.mxu1 %v410_v17  ;;  %v35_v19 = vld [vmem:[%s607_s1] sm:$0xff]  ;;  %v40_v34 = vld [vmem:[%s607_s1 + $0x28] sm:$0xff]  ;;  %v41_v40 = vld [vmem:[%s607_s1 + $0x30] sm:$0xff] }
   0x9   :  { %v39_v33 = vld [vmem:[%s607_s1 + $0x20] sm:$0xff]  ;;  %v42_v41 = vld [vmem:[%s607_s1 + $0x38] sm:$0xff]  ;;  %v44_v48 = vld [vmem:[%s607_s1 + $0x48] sm:$0xff] }
   0xa   :  { %69 = vxpose.xlu0.b32.cont [3/16] %v53_v2, 128  ;;  %v43_v47 = vld [vmem:[%s607_s1 + $0x40] sm:$0xff]  ;;  %v45_v54 = vld [vmem:[%s607_s1 + $0x50] sm:$0xff]  ;;  %v46_v55 = vld [vmem:[%s607_s1 + $0x58] sm:$0xff] }
   0xb   :  { %v47_v61 = vld [vmem:[%s607_s1 + $0x60] sm:$0xff]  ;;  %v48_v62 = vld [vmem:[%s607_s1 + $0x68] sm:$0xff] }
   0xe   :  { %70 = vxpose.xlu0.b32.cont [4/16] %v54_v3, 128 }
  0x12   :  { %71 = vxpose.xlu0.b32.cont [5/16] %v55_v4, 128  ;;  %v49_v4 = vld [vmem:[%s607_s1 + $0x70] sm:$0xff] }
  0x16   :  { %72 = vxpose.xlu0.b32.cont [6/16] %v56_v5, 128  ;;  %v50_v5 = vld [vmem:[%s607_s1 + $0x78] sm:$0xff] }
  0x1a   :  { %73 = vxpose.xlu0.b32.cont [7/16] %v57_v6, 128 }
  0x1e   :  { %74 = vxpose.xlu0.b32.cont [8/16] %v58_v7, 128 }
  0x22   :  { %75 = vxpose.xlu0.b32.cont [9/16] %v59_v8, 128 }
  0x26   :  { %76 = vxpose.xlu0.b32.cont [10/16] %v60_v9, 128 }
  0x2a   :  { %77 = vxpose.xlu0.b32.cont [11/16] %v61_v10, 128  ;;  %v411_v10 = vld [vmem:[%s606_s0 + $0x8] sm:$0xff]  }
  0x2e   :  { %78 = vxpose.xlu0.b32.cont [12/16] %v62_v11, 128  ;;  %v412_v11 = vld [vmem:[%s606_s0 + $0x28] sm:$0xff]  }
  0x32   :  { %79 = vxpose.xlu0.b32.cont [13/16] %v63_v12, 128  ;;  %v413_v12 = vld [vmem:[%s606_s0 + $0x10] sm:$0xff]  }
  0x36   :  { %80 = vxpose.xlu0.b32.cont [14/16] %v64_v13, 128  ;;  %v414_v13 = vld [vmem:[%s606_s0 + $0x30] sm:$0xff]  }
  0x3a   :  { %81 = vxpose.xlu0.b32.cont [15/16] %v65_v14, 128  ;;  %v415_v14 = vld [vmem:[%s606_s0 + $0x18] sm:$0xff]  }
  0x3e   :  { %82 = vxpose.xlu0.b32.end [16/16] %v66_v15, 128  ;;  %v416_v15 = vld [vmem:[%s606_s0 + $0x38] sm:$0xff]  }
  0x82   :  { %v83_v18 = vpop.trf.xlu0 }
  0x83   :  { %v99_v22 = vsub.f32 %v35_v19, %v83_v18 }
  0x86   :  { %v84_v21 = vpop.trf.xlu0 }
  0x87   :  { %v100_v23 = vsub.f32 %v36_v20, %v84_v21 }
  0x89   :  { %v115_v24 = vpack.c.bf16 %v100_v23, %v99_v22 }
  0x8a   :  { %v85_v25 = vpop.trf.xlu0 }
  0x8b   :  { %360 = vmatprep.subr.bf16.mxu0 %v115_v24  ;;  %392 = vmatprep.subr.bf16.mxu1 %v115_v24  ;;  %v101_v29 = vsub.f32 %v37_v26, %v85_v25 }
  0x8c   :  { %361 = vmatpush3.bf16.msra.mxu0 %v115_v24  ;;  %400 = vmatpush3.bf16.msra.mxu1 %v115_v24 }
  0x8e   :  { %v86_v28 = vpop.trf.xlu0 }
  0x8f   :  { %v102_v30 = vsub.f32 %v38_v27, %v86_v28 }
  0x91   :  { %v116_v31 = vpack.c.bf16 %v102_v30, %v101_v29 }
  0x92   :  { %v87_v32 = vpop.trf.xlu0 }
  0x93   :  { %362 = vmatprep.subr.bf16.mxu0 %v116_v31  ;;  %393 = vmatprep.subr.bf16.mxu1 %v116_v31  ;;  %v103_v36 = vsub.f32 %v39_v33, %v87_v32 }
  0x94   :  { %363 = vmatpush3.bf16.msra.mxu0 %v116_v31  ;;  %401 = vmatpush3.bf16.msra.mxu1 %v116_v31 }
  0x96   :  { %v88_v35 = vpop.trf.xlu0 }
  0x97   :  { %v104_v37 = vsub.f32 %v40_v34, %v88_v35 }
  0x99   :  { %v117_v38 = vpack.c.bf16 %v104_v37, %v103_v36 }
  0x9a   :  { %v89_v39 = vpop.trf.xlu0 }
  0x9b   :  { %364 = vmatprep.subr.bf16.mxu0 %v117_v38  ;;  %394 = vmatprep.subr.bf16.mxu1 %v117_v38  ;;  %v105_v43 = vsub.f32 %v41_v40, %v89_v39 }
  0x9c   :  { %365 = vmatpush3.bf16.msra.mxu0 %v117_v38  ;;  %402 = vmatpush3.bf16.msra.mxu1 %v117_v38 }
  0x9e   :  { %v90_v42 = vpop.trf.xlu0 }
  0x9f   :  { %v106_v44 = vsub.f32 %v42_v41, %v90_v42 }
  0xa1   :  { %v118_v45 = vpack.c.bf16 %v106_v44, %v105_v43 }
  0xa2   :  { %v91_v46 = vpop.trf.xlu0 }
  0xa3   :  { %366 = vmatprep.subr.bf16.mxu0 %v118_v45  ;;  %395 = vmatprep.subr.bf16.mxu1 %v118_v45  ;;  %v107_v50 = vsub.f32 %v43_v47, %v91_v46 }
  0xa4   :  { %367 = vmatpush3.bf16.msra.mxu0 %v118_v45  ;;  %403 = vmatpush3.bf16.msra.mxu1 %v118_v45 }
  0xa6   :  { %v92_v49 = vpop.trf.xlu0 }
  0xa7   :  { %v108_v51 = vsub.f32 %v44_v48, %v92_v49 }
  0xa9   :  { %v119_v52 = vpack.c.bf16 %v108_v51, %v107_v50 }
  0xaa   :  { %v93_v53 = vpop.trf.xlu0 }
  0xab   :  { %368 = vmatprep.subr.bf16.mxu0 %v119_v52  ;;  %396 = vmatprep.subr.bf16.mxu1 %v119_v52  ;;  %v109_v57 = vsub.f32 %v45_v54, %v93_v53 }
  0xac   :  { %369 = vmatpush3.bf16.msra.mxu0 %v119_v52  ;;  %404 = vmatpush3.bf16.msra.mxu1 %v119_v52 }
  0xae   :  { %v94_v56 = vpop.trf.xlu0 }
  0xaf   :  { %v110_v58 = vsub.f32 %v46_v55, %v94_v56 }
  0xb1   :  { %v120_v59 = vpack.c.bf16 %v110_v58, %v109_v57 }
  0xb2   :  { %v95_v60 = vpop.trf.xlu0 }
  0xb3   :  { %370 = vmatprep.subr.bf16.mxu0 %v120_v59  ;;  %397 = vmatprep.subr.bf16.mxu1 %v120_v59  ;;  %v111_v0 = vsub.f32 %v47_v61, %v95_v60 }
  0xb4   :  { %371 = vmatpush3.bf16.msra.mxu0 %v120_v59  ;;  %405 = vmatpush3.bf16.msra.mxu1 %v120_v59 }
  0xb6   :  { %v96_v63 = vpop.trf.xlu0 }
  0xb7   :  { %v112_v1 = vsub.f32 %v48_v62, %v96_v63 }
  0xb9   :  { %v121_v2 = vpack.c.bf16 %v112_v1, %v111_v0 }
  0xba   :  { %v97_v3 = vpop.trf.xlu0 }
  0xbb   :  { %372 = vmatprep.subr.bf16.mxu0 %v121_v2  ;;  %398 = vmatprep.subr.bf16.mxu1 %v121_v2  ;;  %v113_v7 = vsub.f32 %v49_v4, %v97_v3 }
  0xbc   :  { %373 = vmatpush3.bf16.msra.mxu0 %v121_v2  ;;  %406 = vmatpush3.bf16.msra.mxu1 %v121_v2 }
  0xbe   :  { %v98_v6 = vpop.trf.xlu0 }
  0xbf   :  { %v114_v8 = vsub.f32 %v50_v5, %v98_v6 }
  0xc1   :  { %v122_v9 = vpack.c.bf16 %v114_v8, %v113_v7 }
  0xc3   :  { %374 = vmatprep.subr.bf16.mxu0 %v122_v9  ;;  %399 = vmatprep.subr.bf16.mxu1 %v122_v9 }
  0xc4   :  { %375 = vmatpush3.bf16.msra.mxu0 %v122_v9  ;;  %407 = vmatpush3.bf16.msra.mxu1 %v122_v9 }
  0xc7   :  { %377 = vmatmul.mubr.bf16.vlgmr.msra.gmra.mrb[0].mxu0 %v411_v10  ;;  %385 = vmatmul.mubr.bf16.vlgmr.msra.gmra.mrb[0].mxu1 %v412_v11 }
  0xc8   :  { %380 = vmatprep.mubr.bf16.mxu0 %v413_v12  ;;  %388 = vmatprep.mubr.bf16.mxu1 %v414_v13 }
  0xcf   :  { %381 = vmatmul.mubr.bf16.gmra.mrb[4].mxu0 %v415_v14  ;;  %389 = vmatmul.mubr.bf16.gmra.mrb[4].mxu1 %v416_v15 }
 0x19a   :  { %v378_v16 = vpop.f32.mrb[0].mxu0  ;;  %v386_v17 = vpop.f32.mrb[0].mxu1 }
 0x19b   :  { %v237_v18 = vpop.f32.mrb[1].mxu0  ;;  %v269_v19 = vpop.f32.mrb[1].mxu1  ;;  %318 = vst [vmem:[%s608_s3 + $0x10] sm:$0xff] %v378_v16  ;;  %326 = vst [vmem:[%s608_s3 + $0x50] sm:$0xff] %v386_v17 }
 0x19c   :  { %v379_v20 = vpop.f32.mrb[2].mxu0  ;;  %v387_v21 = vpop.f32.mrb[2].mxu1  ;;  %316 = vst [vmem:[%s608_s3] sm:$0xff] %v237_v18  ;;  %324 = vst [vmem:[%s608_s3 + $0x40] sm:$0xff] %v269_v19 }
 0x19d   :  { %v240_v22 = vpop.f32.mrb[3].mxu0  ;;  %v272_v23 = vpop.f32.mrb[3].mxu1  ;;  %319 = vst [vmem:[%s608_s3 + $0x18] sm:$0xff] %v379_v20  ;;  %327 = vst [vmem:[%s608_s3 + $0x58] sm:$0xff] %v387_v21 }
 0x19e   :  { %317 = vst [vmem:[%s608_s3 + $0x8] sm:$0xff] %v240_v22  ;;  %325 = vst [vmem:[%s608_s3 + $0x48] sm:$0xff] %v272_v23 }
 0x1a2   :  { %v382_v24 = vpop.f32.mrb[4].mxu0  ;;  %v390_v25 = vpop.f32.mrb[4].mxu1 }
 0x1a3   :  { %v253_v26 = vpop.f32.mrb[5].mxu0  ;;  %v285_v27 = vpop.f32.mrb[5].mxu1  ;;  %322 = vst [vmem:[%s608_s3 + $0x30] sm:$0xff] %v382_v24  ;;  %330 = vst [vmem:[%s608_s3 + $0x70] sm:$0xff] %v390_v25 }
 0x1a4   :  { %v383_v28 = vpop.f32.mrb[6].mxu0  ;;  %v391_v29 = vpop.f32.mrb[6].mxu1  ;;  %320 = vst [vmem:[%s608_s3 + $0x20] sm:$0xff] %v253_v26  ;;  %328 = vst [vmem:[%s608_s3 + $0x60] sm:$0xff] %v285_v27 }
 0x1a5   :  { %v256_v30 = vpop.f32.mrb[7].mxu0  ;;  %v288_v31 = vpop.f32.mrb[7].mxu1  ;;  %323 = vst [vmem:[%s608_s3 + $0x38] sm:$0xff] %v383_v28  ;;  %331 = vst [vmem:[%s608_s3 + $0x78] sm:$0xff] %v391_v29 }
 0x1a6   :  { %321 = vst [vmem:[%s608_s3 + $0x28] sm:$0xff] %v256_v30  ;;  %329 = vst [vmem:[%s608_s3 + $0x68] sm:$0xff] %v288_v31 }

</bundles_post_ra>
